<compile_context>
chip_gen: v6e
topology: v6e:2x2x1
jax: 0.10.0
libtpu: 0.0.40
codegen_flags: <defaults>
</compile_context>

<pallas_src>
import functools

import jax
import jax.numpy as jnp
from jax.experimental import pallas as pl
from jax.experimental.pallas import tpu as pltpu


_LANES = 128
_MAX_TILE_ROWS = 1024        # 1024 * 128 * 4 B = 512 KiB per input tile (v7x-safe)
_PALLAS_MIN_N = 1024         # below this, plain jnp beats pallas_call launch overhead


def _round_up(n, m):
    return (n + m - 1) // m * m


def _hyperboloid_kernel(x_ref, y_ref, out_ref, *, scale, bias):
    # x_ref / y_ref / out_ref: (tile_rows, 128) lane-dense VMEM tiles.
    x = x_ref[...]
    y = y_ref[...]
    # sqrt lowers to the EUP slot, which is otherwise idle in this mem-bound kernel.
    out_ref[...] = jnp.sqrt(scale * (x * x + y * y) - bias)


def pytorch_hyperboloid_forward(data, a, c, *, force_pallas=False):
    """Pallas equivalent of pytorch_hyperboloid(a, c).forward(data)."""
    N, _ = data.shape
    dtype = data.dtype
    a = float(a)
    c = float(c)
    scale = (c * c) / (a * a)
    bias = c * c

    x = data[:, 0]
    y = data[:, 1]

    # Tiny-N fast path: let XLA fuse it; a custom kernel only pays off once the
    # problem is HBM-bandwidth limited.
    if N < _PALLAS_MIN_N and not force_pallas:
        return jnp.sqrt(scale * (x * x + y * y) - bias).reshape(N, 1).astype(dtype)

    # Lane-dense relayout: pack the flat x / y vectors across the 128-lane axis.
    rows = _round_up(N, _LANES) // _LANES
    tile_rows = min(_MAX_TILE_ROWS, _round_up(rows, 8))
    rows_pad = _round_up(rows, tile_rows)
    n_pad = rows_pad * _LANES
    pad = n_pad - N

    # Pad x with `a` and y with 0 so padded lanes evaluate to sqrt(0) == 0 (no NaNs);
    # padded rows are sliced off afterwards anyway.
    x = jnp.pad(x, (0, pad), constant_values=a).reshape(rows_pad, _LANES)
    y = jnp.pad(y, (0, pad), constant_values=0.0).reshape(rows_pad, _LANES)

    kernel = functools.partial(_hyperboloid_kernel, scale=scale, bias=bias)
    grid = (rows_pad // tile_rows,)

    z = pl.pallas_call(
        kernel,
        out_shape=jax.ShapeDtypeStruct((rows_pad, _LANES), dtype),
        grid_spec=pltpu.PrefetchScalarGridSpec(
            num_scalar_prefetch=0,
            grid=grid,
            in_specs=[
                pl.BlockSpec((tile_rows, _LANES), lambda i: (i, 0)),
                pl.BlockSpec((tile_rows, _LANES), lambda i: (i, 0)),
            ],
            out_specs=pl.BlockSpec((tile_rows, _LANES), lambda i: (i, 0)),
        ),
        compiler_params=pltpu.CompilerParams(
            dimension_semantics=("parallel",)),
    )(x, y)

    return z.reshape(n_pad)[:N].reshape(N, 1)


if __name__ == "__main__":
    key = jax.random.PRNGKey(0)
    k1, k2 = jax.random.split(key)
    a, c = 0.5, 1.5

    # --- Pallas path (small shape; force_pallas exercises padding + relayout) ---
    N, D = 200, 4
    # Values in [1, 3] guarantee x^2/a^2 + y^2/a^2 - 1 > 0 (real sqrt).
    data = jax.random.uniform(k1, (N, D), dtype=jnp.float32, minval=1.0, maxval=3.0)
    out = pytorch_hyperboloid_forward(data, a, c, force_pallas=True)
    out = jax.block_until_ready(out)

    xv, yv = data[:, 0], data[:, 1]
    ref = jnp.sqrt(c ** 2 * (xv ** 2 / a ** 2 + yv ** 2 / a ** 2 - 1.0)).reshape(N, 1)
    assert out.shape == (N, 1)
    assert jnp.allclose(out, ref, rtol=1e-5, atol=1e-5)

    # --- Tiny-N fast path (plain jnp, no Pallas launch) ---
    N2 = 8
    data2 = jax.random.uniform(k2, (N2, D), dtype=jnp.float32, minval=1.0, maxval=3.0)
    out2 = jax.block_until_ready(pytorch_hyperboloid_forward(data2, a, c))
    x2, y2 = data2[:, 0], data2[:, 1]
    ref2 = jnp.sqrt(c ** 2 * (x2 ** 2 / a ** 2 + y2 ** 2 / a ** 2 - 1.0)).reshape(N2, 1)
    assert out2.shape == (N2, 1)
    assert jnp.allclose(out2, ref2, rtol=1e-5, atol=1e-5)

    print("KERNEL_OK")
</pallas_src>

<mosaic_0001>
module attributes {stable_mosaic.version = 11 : i64} {
  func.func @_hyperboloid_kernel(%arg0: i32, %arg1: memref<8x128xf32, #tpu.memory_space<vmem>>, %arg2: memref<8x128xf32, #tpu.memory_space<vmem>>, %arg3: memref<8x128xf32, #tpu.memory_space<vmem>>) attributes {dimension_semantics = [#tpu.dimension_semantics<parallel>], iteration_bounds = array<i64: 1>, scalar_prefetch = 0 : i64, scratch_operands = 0 : i64, tpu.core_type = #tpu.core_type<tc>, window_params = [{transform_indices = @transform_0, window_bounds = array<i64: 8, 128>}, {transform_indices = @transform_1, window_bounds = array<i64: 8, 128>}, {transform_indices = @transform_2, window_bounds = array<i64: 8, 128>}]} {
    %c0 = arith.constant 0 : index
    %c0_0 = arith.constant 0 : index
    %0 = vector.load %arg1[%c0, %c0_0] : memref<8x128xf32, #tpu.memory_space<vmem>>, vector<8x128xf32>
    %c0_1 = arith.constant 0 : index
    %c0_2 = arith.constant 0 : index
    %1 = vector.load %arg2[%c0_1, %c0_2] : memref<8x128xf32, #tpu.memory_space<vmem>>, vector<8x128xf32>
    %2 = arith.mulf %0, %0 : vector<8x128xf32>
    %3 = arith.mulf %1, %1 : vector<8x128xf32>
    %4 = arith.addf %2, %3 : vector<8x128xf32>
    %cst = arith.constant 9.000000e+00 : f32
    %5 = vector.broadcast %cst : f32 to vector<8x128xf32>
    %6 = arith.mulf %5, %4 : vector<8x128xf32>
    %cst_3 = arith.constant 2.250000e+00 : f32
    %7 = vector.broadcast %cst_3 : f32 to vector<8x128xf32>
    %8 = arith.subf %6, %7 : vector<8x128xf32>
    %9 = math.sqrt %8 : vector<8x128xf32>
    %c0_4 = arith.constant 0 : index
    %c0_5 = arith.constant 0 : index
    %10 = vector.load %arg3[%c0_4, %c0_5] : memref<8x128xf32, #tpu.memory_space<vmem>>, vector<8x128xf32>
    tpu.vector_store %arg3[%c0_4, %c0_5], %9 {strides = array<i32>} : memref<8x128xf32, #tpu.memory_space<vmem>>, vector<8x128xf32>,
    return
  }
  func.func @transform_0(%arg0: i32) -> (i32, i32) {
    %c0_i32 = arith.constant 0 : i32
    %c0_i32_0 = arith.constant 0 : i32
    return %arg0, %c0_i32 : i32, i32
  }
  func.func @transform_1(%arg0: i32) -> (i32, i32) {
    %c0_i32 = arith.constant 0 : i32
    %c0_i32_0 = arith.constant 0 : i32
    return %arg0, %c0_i32 : i32, i32
  }
  func.func @transform_2(%arg0: i32) -> (i32, i32) {
    %c0_i32 = arith.constant 0 : i32
    %c0_i32_0 = arith.constant 0 : i32
    return %arg0, %c0_i32 : i32, i32
  }
}

</mosaic_0001>

<bundles_post_ra>
// kernel: tpu_custom_call.1
= control target key start
LH: loop header
LB: loop body
LE: loop exit
PB: predicated region body
PF: predicated region fallthrough
CT: control target
= control target key end

     0   :  { %7 = vsyncpa [#allocation3], 0  ;;  %s166_s0 = inlined_call_operand.hbm [shape: f32[8,128], index: 0, kind: input, shape index: {}]   ;;  %s167_s1 = inlined_call_operand.hbm [shape: f32[8,128], index: 1, kind: input, shape index: {}]   ;;  %s168_s2 = inlined_call_operand.hbm [shape: f32[8,128], index: 2, kind: output, shape index: {}]  }
   0x1   :  { %8 = vsyncpa [#allocation6], 0 }
   0x2   :  { %9 = vsyncpa [#allocation4], 0  ;;  %s139_s9 = smov [#allocation2]   ;;  %s140_s11 = smov [#allocation5]  }
   0x3   :  { %s16_s10 = sshll.u32 %s139_s9, 4  ;;  %s26_s12 = sshll.u32 %s140_s11, 4  ;;  %s17_s10 = int_to_ptr.vmem [resolvable:$true] %s16_s10  ;;  %s27_s12 = int_to_ptr.vmem [resolvable:$true] %s26_s12 }
   0x4   :  { %s81_s13 = scalar_lea.vmem %s17_s10, 128  ;;  %p86_p1 = scmp.lt.s32.totalorder %s17_s10, %s17_s10 }
   0x5   :  { %p82_p0 = scmp.ne.s32.totalorder %s17_s10, %s81_s13  ;;  %p87_p2 = scmp.lt.s32.totalorder %s81_s13, %s81_s13 }
   0x7   :  { %p88_p3 = por %p87_p2, %p86_p1 }
   0x9   :  { %p89_p4 = pnand %p88_p3, %p82_p0 }
   0xb   :  { %92 = shalt.err (!%p89_p4)
}
   0xc   :  { %19 = dma.hbm_to_vmem [thread:$0]  %s166_s0, 128, %s17_s10, [#allocation3]  }
   0xd   :  { %s101_s16 = scalar_lea.vmem %s27_s12, 128  ;;  %p106_p6 = scmp.lt.s32.totalorder %s27_s12, %s27_s12 }
   0xe   :  { %p102_p5 = scmp.ne.s32.totalorder %s27_s12, %s101_s16  ;;  %p107_p7 = scmp.lt.s32.totalorder %s101_s16, %s101_s16 }
  0x10   :  { %p108_p8 = por %p107_p7, %p106_p6 }
  0x12   :  { %p109_p9 = pnand %p108_p8, %p102_p5 }
  0x14   :  { %112 = shalt.err (!%p109_p9)
}
  0x15   :  { %29 = dma.hbm_to_vmem [thread:$0]  %s167_s1, 128, %s27_s12, [#allocation6]  }
  0x16   :  { %133 = dma.done.wait [#allocation3], 128  }
  0x17   :  { %134 = vsyncadd [#allocation3], 4294967168 }
  0x18   :  { %135 = dma.done.wait [#allocation6], 128  }
  0x19   :  { %136 = vsyncadd [#allocation6], 4294967168  ;;  %v36_v0 = vld [vmem:[#allocation2] sm:$0xff]  ;;  %v37_v1 = vld [vmem:[#allocation5] sm:$0xff]  ;;  %s141_s0 = smov [#allocation7]  }
  0x1a   :  { %v38_v2 = vmul.f32 %v36_v0, %v36_v0  ;;  %v39_v3 = vmul.f32 %v37_v1, %v37_v1  ;;  %s57_s19 = sshll.u32 %s141_s0, 4  ;;  %s58_s19 = int_to_ptr.vmem [resolvable:$true] %s57_s19 }
  0x1b   :  { %s113_s1 = scalar_lea.vmem %s58_s19, 128  ;;  %p118_p11 = scmp.lt.s32.totalorder %s58_s19, %s58_s19 }
  0x1c   :  { %v40_v4 = vadd.f32 %v39_v3, %v38_v2  ;;  %p114_p10 = scmp.ne.s32.totalorder %s58_s19, %s113_s1  ;;  %p119_p12 = scmp.lt.s32.totalorder %s113_s1, %s113_s1 }
  0x1e   :  { %v41_v5 = vmul.f32 9.0, %v40_v4  ;;  %p120_p13 = por %p119_p12, %p118_p11 }
  0x20   :  { %v67_v6 = vadd.f32 -2.25, %v41_v5  ;;  %p121_p0 = pnand %p120_p13, %p114_p10 }
  0x22   :  { %71 = vrsqrt.f32 %v67_v6  ;;  %vm45_vm0 = vcmp.eq.f32.partialorder %v67_v6, inf  ;;  %v48_v8 = vand.u32 2147483648, %v67_v6  ;;  %vm47_vm1 = vcmp.eq.f32.partialorder %v67_v6, 0.0 }
  0x2f   :  { %v72_v7 = vpop.eup %71 }
  0x30   :  { %v44_v9 = vmul.f32 %v72_v7, %v67_v6 }
  0x32   :  { %v46_v10 = vsel %vm45_vm0, %v67_v6, %v44_v9 }
  0x33   :  { %v49_v11 = vsel %vm47_vm1, %v48_v8, %v46_v10 }
  0x34   :  { %50 = vst [vmem:[#allocation7] sm:$0xff] %v49_v11 }
  0x35   :  { %124 = shalt.err (!%p121_p0)
}
  0x36   :  { %60 = dma.vmem_to_hbm [thread:$0]  %s58_s19, 128, %s168_s2, [#allocation4]  }
  0x37   :  { %137 = dma.done.wait [#allocation4], 128  }
  0x38   :  { %138 = vsyncadd [#allocation4], 4294967168 }
  0x39   :  { %64 = vsyncpa [#allocation3], 1 }
  0x3a   :  { %65 = vsyncpa [#allocation6], 1 }
  0x3b   :  { %66 = vsyncpa [#allocation4], 1 }

</bundles_post_ra>
